<compile_context>
chip_gen: v5e
topology: v5e:2x2
jax: 0.10.0
libtpu: 0.0.40
codegen_flags: <defaults>
</compile_context>

<pallas_src>
import functools
import math

import jax
import jax.numpy as jnp
from jax import lax
from jax.experimental import pallas as pl
from jax.experimental.pallas import tpu as pltpu

_LANES = 128


def _vmem_capacity_bytes():
    """Physical VMEM of the local TPU generation (conservative fallback)."""
    try:
        info = pltpu.get_tpu_info()
        for attr in ("vmem_capacity_bytes", "vmem_size_bytes", "vmem_bytes"):
            cap = getattr(info, attr, None)
            if cap:
                return int(cap)
    except Exception:
        pass
    return 64 * 1024 * 1024  # v7x-sized fallback, safe everywhere


def _label_smoothing_kernel(x_ref, tgt_ref, partial_ref, *maybe_tdist_ref,
                            n_rows, confidence, base, c_logc, b_logb,
                            padding_idx):
    """One row tile: smoothed-target KL-loss contribution (+ optional dist).

    x_ref:       (tile_n, V) log-probabilities (any float dtype; cast to f32)
    tgt_ref:     (tile_n, 1) int32 class indices
    partial_ref: (1, 128)    per-tile partial loss (scalar in lane 0)
    maybe_tdist_ref: optional (tile_n, V) true_dist output
    """
    x = x_ref[...].astype(jnp.float32)
    tgt = tgt_ref[...]
    tile_n, v = x.shape

    col = lax.broadcasted_iota(jnp.int32, (tile_n, v), 1)
    is_tgt = col == tgt                       # scatter_(1, target, confidence)

    # Hot path (per element): 1 compare + 1 select + 1 mul, then a row reduce.
    #   sum(true_dist * x) over a non-padding row
    #     = rowsum(x * select(is_tgt, c, b)) - b * x[:, padding_idx]
    scaled = x * jnp.where(is_tgt, confidence, base)
    row_tdx = jnp.sum(scaled, axis=-1, keepdims=True)        # (tile_n, 1)
    x_pad = x[:, padding_idx:padding_idx + 1]                 # static 1-col slice

    # sum(true_dist * log(true_dist)) per non-padding row is a constant:
    # one column at confidence, V-2 columns at base, padding column is 0.
    row_const = c_logc + (v - 2) * b_logb

    # Mask padded-target rows and rows past the (ragged) batch end.
    row0 = pl.program_id(0) * tile_n
    row_idx = row0 + lax.broadcasted_iota(jnp.int32, (tile_n, 1), 0)
    row_valid = (tgt != padding_idx) & (row_idx < n_rows)     # (tile_n, 1)

    row_loss = row_const - row_tdx + base * x_pad
    row_loss = jnp.where(row_valid, row_loss, 0.0)
    s = jnp.sum(row_loss)

    lane = lax.broadcasted_iota(jnp.int32, (1, _LANES), 1)
    partial_ref[...] = jnp.where(lane == 0, s, 0.0)

    if maybe_tdist_ref:
        td_ref = maybe_tdist_ref[0]
        # One select per element; padded-target rows zeroed by the (tile_n,1)
        # broadcast select; out-of-range rows are clipped at writeback.
        td = jnp.where(is_tgt, confidence, base)
        td = jnp.where(tgt == padding_idx, 0.0, td)
        td_ref[...] = td.astype(td_ref.dtype)
        # Zero the padding_idx column with a single static 1-column store
        # instead of a full-width (tile_n, V) compare+select.
        td_ref[:, padding_idx:padding_idx + 1] = jnp.zeros(
            (tile_n, 1), td_ref.dtype)


def _choose_tile_n(n, v, x_itemsize, td_itemsize, budget, sublane):
    """Largest row tile whose double-buffered pipeline state fits `budget`."""
    # Double-buffered x tile + lane-padded (tile_n,1) int32 target tile
    # (+ true_dist tile when emitted).
    bytes_per_row = 2 * v * x_itemsize + 2 * _LANES * 4
    if td_itemsize:
        bytes_per_row += 2 * v * td_itemsize
    tile = budget // max(bytes_per_row, 1)
    tile = min(tile, n, 1024)
    # Keep >= 2 grid steps when possible so both v7x TensorCores get work.
    if n > sublane:
        half = (n + 1) // 2
        half = ((half + sublane - 1) // sublane) * sublane
        tile = min(tile, half)
    tile = max(sublane, (tile // sublane) * sublane)
    return tile


def label_smoothing_loss(x, target, *, size, padding_idx, smoothing,
                         return_true_dist=False, tile_n=None):
    """Returns loss (and optionally true_dist) matching the PyTorch module.

    x may be f32 or bf16 (kept in its HBM dtype; accumulation is f32).
    """
    n, v = x.shape
    assert v == size
    assert size > 2, "size <= 2 divides by zero in smoothing/(size-2)"

    confidence = 1.0 - float(smoothing)
    base = float(smoothing) / (size - 2)
    c_logc = confidence * math.log(confidence) if confidence > 0.0 else 0.0
    b_logb = base * math.log(base) if base > 0.0 else 0.0

    x_itemsize = jnp.dtype(x.dtype).itemsize
    sublane = max(8, 32 // x_itemsize)        # 8 (f32) / 16 (bf16) / 32 (int8)
    vmem_cap = _vmem_capacity_bytes()
    budget = int(vmem_cap * 0.4)              # pipeline double-buffer budget

    if tile_n is None:
        tile_n = _choose_tile_n(
            n, v, x_itemsize,
            x_itemsize if return_true_dist else 0,
            budget, sublane)
    tile_n = max(sublane, (int(tile_n) // sublane) * sublane)

    num_tiles = (n + tile_n - 1) // tile_n    # ragged last tile, no jnp.pad
    target2d = target.astype(jnp.int32).reshape(n, 1)

    kernel = functools.partial(
        _label_smoothing_kernel,
        n_rows=n, confidence=confidence, base=base,
        c_logc=c_logc, b_logb=b_logb, padding_idx=int(padding_idx))

    out_shape = [jax.ShapeDtypeStruct((1, num_tiles * _LANES), jnp.float32)]
    out_specs = [pl.BlockSpec((1, _LANES), lambda i: (0, i))]
    bytes_out = num_tiles * _LANES * 4
    if return_true_dist:
        out_shape.append(jax.ShapeDtypeStruct((n, v), x.dtype))
        out_specs.append(pl.BlockSpec((tile_n, v), lambda i: (i, 0)))
        bytes_out += n * v * x_itemsize

    # VMEM accounting: double-buffered tiles; (tile_n,1) / (1,128) buffers are
    # lane/sublane-padded by the layout.
    vmem_est = 2 * (tile_n * v * x_itemsize       # x tile
                    + tile_n * _LANES * 4         # target tile (lane-padded)
                    + 8 * _LANES * 4)             # partial tile
    if return_true_dist:
        vmem_est += 2 * tile_n * v * x_itemsize
    vmem_limit = int(min(vmem_cap * 3 // 4,
                         max(16 * 1024 * 1024,
                             int(vmem_est * 1.5) + (2 << 20))))

    cost = pl.CostEstimate(
        flops=3 * n * v,
        transcendentals=0,
        bytes_accessed=n * v * x_itemsize + n * 4 + bytes_out)

    outs = pl.pallas_call(
        kernel,
        out_shape=tuple(out_shape),
        grid_spec=pltpu.PrefetchScalarGridSpec(
            num_scalar_prefetch=0,
            grid=(num_tiles,),
            in_specs=[
                pl.BlockSpec((tile_n, v), lambda i: (i, 0)),
                pl.BlockSpec((tile_n, 1), lambda i: (i, 0)),
            ],
            out_specs=tuple(out_specs),
        ),
        compiler_params=pltpu.CompilerParams(
            dimension_semantics=("parallel",),
            vmem_limit_bytes=vmem_limit),
        cost_estimate=cost,
    )(x, target2d)

    if return_true_dist:
        partial, true_dist = outs
        return jnp.sum(partial), true_dist
    (partial,) = outs
    return jnp.sum(partial)


def _reference(x, target, *, size, padding_idx, smoothing):
    confidence = 1.0 - smoothing
    n, v = x.shape
    true_dist = jnp.full((n, v), smoothing / (size - 2), jnp.float32)
    true_dist = true_dist.at[jnp.arange(n), target].set(confidence)
    true_dist = true_dist.at[:, padding_idx].set(0.0)
    true_dist = jnp.where((target == padding_idx)[:, None], 0.0, true_dist)
    elem = jnp.where(
        true_dist > 0.0,
        true_dist * (jnp.log(jnp.where(true_dist > 0, true_dist, 1.0)) - x),
        0.0)
    return jnp.sum(elem), true_dist


if __name__ == "__main__":
    key = jax.random.PRNGKey(0)
    N, V = 19, 32              # N deliberately not a tile multiple (ragged path)
    PAD, SMOOTH = 0, 0.1

    kx, kt = jax.random.split(key)
    logits = jax.random.normal(kx, (N, V), jnp.float32)
    x = jax.nn.log_softmax(logits, axis=-1)      # KLDivLoss expects log-probs
    target = jax.random.randint(kt, (N,), 0, V, jnp.int32)
    target = target.at[3].set(PAD)               # include a padded position

    # Parity path (also returns true_dist, like the module's self.true_dist).
    loss, true_dist = label_smoothing_loss(
        x, target, size=V, padding_idx=PAD, smoothing=SMOOTH,
        return_true_dist=True)
    loss = jax.block_until_ready(loss)
    true_dist = jax.block_until_ready(true_dist)

    # Fast path: loss only (no true_dist writeback -> half the HBM traffic).
    loss_only = jax.block_until_ready(
        label_smoothing_loss(x, target, size=V, padding_idx=PAD,
                             smoothing=SMOOTH))

    ref_loss, ref_td = _reference(x, target, size=V, padding_idx=PAD,
                                  smoothing=SMOOTH)
    assert jnp.allclose(loss, ref_loss, rtol=1e-4, atol=1e-4), (loss, ref_loss)
    assert jnp.allclose(loss_only, ref_loss, rtol=1e-4, atol=1e-4), (
        loss_only, ref_loss)
    assert jnp.allclose(true_dist, ref_td, rtol=1e-6, atol=1e-6)

    print("KERNEL_OK")
</pallas_src>

<mosaic_0001>
module attributes {stable_mosaic.version = 11 : i64} {
  func.func @_label_smoothing_kernel(%arg0: i32, %arg1: memref<16x32xf32, #tpu.memory_space<vmem>>, %arg2: memref<16x1xi32, #tpu.memory_space<vmem>>, %arg3: memref<1x128xf32, #tpu.memory_space<vmem>>, %arg4: memref<16x32xf32, #tpu.memory_space<vmem>>) attributes {dimension_semantics = [#tpu.dimension_semantics<parallel>], iteration_bounds = array<i64: 2>, scalar_prefetch = 0 : i64, scratch_operands = 0 : i64, tpu.core_type = #tpu.core_type<tc>, window_params = [{transform_indices = @transform_0, window_bounds = array<i64: 16, 32>}, {transform_indices = @transform_1, window_bounds = array<i64: 16, 1>}, {transform_indices = @transform_2, window_bounds = array<i64: 1, 128>}, {transform_indices = @transform_3, window_bounds = array<i64: 16, 32>}]} {
    %c0 = arith.constant 0 : index
    %c0_0 = arith.constant 0 : index
    %0 = vector.load %arg1[%c0, %c0_0] : memref<16x32xf32, #tpu.memory_space<vmem>>, vector<16x32xf32>
    %c0_1 = arith.constant 0 : index
    %c0_2 = arith.constant 0 : index
    %1 = vector.load %arg2[%c0_1, %c0_2] : memref<16x1xi32, #tpu.memory_space<vmem>>, vector<16x1xi32>
    %2 = tpu.iota {dimensions = array<i32: 1>} : vector<16x32xi32>
    %3 = vector.broadcast %1 : vector<16x1xi32> to vector<16x32xi32>
    %4 = arith.cmpi eq, %2, %3 : vector<16x32xi32>
    %cst = arith.constant 0.899999976 : f32
    %cst_3 = arith.constant 0.00333333341 : f32
    %5 = vector.broadcast %cst : f32 to vector<16x32xf32>
    %6 = vector.broadcast %cst_3 : f32 to vector<16x32xf32>
    %7 = arith.select %4, %5, %6 : vector<16x32xi1>, vector<16x32xf32>
    %8 = arith.mulf %0, %7 : vector<16x32xf32>
    %cst_4 = arith.constant dense<0.000000e+00> : vector<16xf32>
    %9 = vector.multi_reduction <add>, %8, %cst_4 [1] : vector<16x32xf32> to vector<16xf32>
    %10 = vector.shape_cast %9 : vector<16xf32> to vector<16x1xf32>
    %11 = vector.extract_strided_slice %0 {offsets = [0, 0], sizes = [16, 1], strides = [1, 1]} : vector<16x32xf32> to vector<16x1xf32>
    %c16_i32 = arith.constant 16 : i32
    %12 = arith.muli %arg0, %c16_i32 : i32
    %13 = tpu.iota {dimensions = array<i32: 0>} : vector<16x1xi32>
    %14 = vector.broadcast %12 : i32 to vector<16x1xi32>
    %15 = arith.addi %14, %13 : vector<16x1xi32>
    %c0_i32 = arith.constant 0 : i32
    %16 = vector.broadcast %c0_i32 : i32 to vector<16x1xi32>
    %17 = arith.cmpi ne, %1, %16 : vector<16x1xi32>
    %c19_i32 = arith.constant 19 : i32
    %18 = vector.broadcast %c19_i32 : i32 to vector<16x1xi32>
    %19 = arith.cmpi slt, %15, %18 : vector<16x1xi32>
    %20 = arith.andi %17, %19 : vector<16x1xi1>
    %cst_5 = arith.constant -0.665202737 : f32
    %21 = vector.broadcast %cst_5 : f32 to vector<16x1xf32>
    %22 = arith.subf %21, %10 : vector<16x1xf32>
    %cst_6 = arith.constant 0.00333333341 : f32
    %23 = vector.broadcast %cst_6 : f32 to vector<16x1xf32>
    %24 = arith.mulf %23, %11 : vector<16x1xf32>
    %25 = arith.addf %22, %24 : vector<16x1xf32>
    %cst_7 = arith.constant 0.000000e+00 : f32
    %26 = vector.broadcast %cst_7 : f32 to vector<16x1xf32>
    %27 = arith.select %20, %25, %26 : vector<16x1xi1>, vector<16x1xf32>
    %28 = vector.shape_cast %27 : vector<16x1xf32> to vector<1x16x1xf32>
    %cst_8 = arith.constant dense<0.000000e+00> : vector<1xf32>
    %29 = vector.multi_reduction <add>, %28, %cst_8 [1, 2] : vector<1x16x1xf32> to vector<1xf32>
    %30 = vector.shape_cast %29 : vector<1xf32> to vector<1x1x1xf32>
    %31 = vector.extract %30[0, 0, 0] : f32 from vector<1x1x1xf32>
    %32 = tpu.iota {dimensions = array<i32: 1>} : vector<1x128xi32>
    %c0_i32_9 = arith.constant 0 : i32
    %33 = vector.broadcast %c0_i32_9 : i32 to vector<1x128xi32>
    %34 = arith.cmpi eq, %32, %33 : vector<1x128xi32>
    %cst_10 = arith.constant 0.000000e+00 : f32
    %35 = vector.broadcast %31 : f32 to vector<1x128xf32>
    %36 = vector.broadcast %cst_10 : f32 to vector<1x128xf32>
    %37 = arith.select %34, %35, %36 : vector<1x128xi1>, vector<1x128xf32>
    %c0_11 = arith.constant 0 : index
    %c0_12 = arith.constant 0 : index
    %38 = vector.load %arg3[%c0_11, %c0_12] : memref<1x128xf32, #tpu.memory_space<vmem>>, vector<1x128xf32>
    tpu.vector_store %arg3[%c0_11, %c0_12], %37 {strides = array<i32>} : memref<1x128xf32, #tpu.memory_space<vmem>>, vector<1x128xf32>,
    %cst_13 = arith.constant 0.899999976 : f32
    %cst_14 = arith.constant 0.00333333341 : f32
    %39 = vector.broadcast %cst_13 : f32 to vector<16x32xf32>
    %40 = vector.broadcast %cst_14 : f32 to vector<16x32xf32>
    %41 = arith.select %4, %39, %40 : vector<16x32xi1>, vector<16x32xf32>
    %c0_i32_15 = arith.constant 0 : i32
    %42 = vector.broadcast %c0_i32_15 : i32 to vector<16x1xi32>
    %43 = arith.cmpi eq, %1, %42 : vector<16x1xi32>
    %cst_16 = arith.constant 0.000000e+00 : f32
    %44 = vector.shape_cast %43 : vector<16x1xi1> to vector<16x1xi1>
    %45 = vector.broadcast %44 : vector<16x1xi1> to vector<16x32xi1>
    %46 = vector.broadcast %cst_16 : f32 to vector<16x32xf32>
    %47 = arith.select %45, %46, %41 : vector<16x32xi1>, vector<16x32xf32>
    %c0_17 = arith.constant 0 : index
    %c0_18 = arith.constant 0 : index
    %48 = vector.load %arg4[%c0_17, %c0_18] : memref<16x32xf32, #tpu.memory_space<vmem>>, vector<16x32xf32>
    tpu.vector_store %arg4[%c0_17, %c0_18], %47 {strides = array<i32>} : memref<16x32xf32, #tpu.memory_space<vmem>>, vector<16x32xf32>,
    %cst_19 = arith.constant 0.000000e+00 : f32
    %49 = vector.broadcast %cst_19 : f32 to vector<16x1xf32>
    %c0_20 = arith.constant 0 : index
    %c0_21 = arith.constant 0 : index
    %50 = vector.load %arg4[%c0_20, %c0_21] : memref<16x32xf32, #tpu.memory_space<vmem>>, vector<16x1xf32>
    tpu.vector_store %arg4[%c0_20, %c0_21], %49 {strides = array<i32>} : memref<16x32xf32, #tpu.memory_space<vmem>>, vector<16x1xf32>,
    return
  }
  func.func @transform_0(%arg0: i32) -> (i32, i32) {
    %c0_i32 = arith.constant 0 : i32
    %c0_i32_0 = arith.constant 0 : i32
    return %arg0, %c0_i32 : i32, i32
  }
  func.func @transform_1(%arg0: i32) -> (i32, i32) {
    %c0_i32 = arith.constant 0 : i32
    %c0_i32_0 = arith.constant 0 : i32
    return %arg0, %c0_i32 : i32, i32
  }
  func.func @transform_2(%arg0: i32) -> (i32, i32) {
    %c0_i32 = arith.constant 0 : i32
    %c0_i32_0 = arith.constant 0 : i32
    return %c0_i32, %arg0 : i32, i32
  }
  func.func @transform_3(%arg0: i32) -> (i32, i32) {
    %c0_i32 = arith.constant 0 : i32
    %c0_i32_0 = arith.constant 0 : i32
    return %arg0, %c0_i32 : i32, i32
  }
}

</mosaic_0001>

<bundles_post_ra>
// kernel: tpu_custom_call.1
= control target key start
LH: loop header
LB: loop body
LE: loop exit
PB: predicated region body
PF: predicated region fallthrough
CT: control target
= control target key end

     0   :  { %9 = vsyncpa [#allocation3], 0  ;;  %s849_s0 = inlined_call_operand.vmem [shape: f32[19,32], index: 0, kind: input, shape index: {}]   ;;  %s850_s1 = inlined_call_operand.vmem [shape: s32[19,1], index: 1, kind: input, shape index: {}]   ;;  %s851_s2 = inlined_call_operand.hbm [shape: f32[1,256], index: 2, kind: output, shape index: {0}]   ;;  %s852_s3 = inlined_call_operand.hbm [shape: f32[19,32], index: 3, kind: output, shape index: {1}]  }
   0x1   :  { %11 = vsyncpa [#allocation3 + $0x1], 0 }
   0x2   :  { %12 = vsyncpa [#allocation5], 0 }
   0x3   :  { %14 = vsyncpa [#allocation5 + $0x1], 0  ;;  %s676_s12 = smov 0   ;;  %s678_s13 = smov 0  }
   0x4   :  { %s680_s14 = smov 0   ;;  %s682_s15 = smov 0  }
   0x5 LB: > { %s697_s16 = sadd.s32 4294967295, %s648_s15   ;;  %s471_s17 = sadd.s32 4294967294, %s648_s15   ;;  %s648_s15 = sphi %s682_s15, %s859_s15   ;;  %s644_s14 = sphi %s680_s14, %s858_s14   ;;  %s640_s13 = sphi %s678_s13, %s857_s13   ;;  %s636_s12 = sphi %s676_s12, %s856_s12  }
   0x6   : > { %s701_s18 = sadd.s32 1, %s648_s15   ;;  %s79_s19 = sadd.s32 1, %s644_s14 }
   0x7   : > { %s76_s20 = ssub.s32 %s648_s15, %s701_s18  ;;  %p89_p0 = scmp.ne.s32.totalorder %s644_s14, %s640_s13 }
   0x8   : > { %p77_p1 = scmp.eq.s32.totalorder %s76_s20, 0  ;;  %p90_p2 = scmp.eq.s32.totalorder %s697_s16, 1 }
   0x9   : > { %p95_p3 = scmp.ne.s32.totalorder %s640_s13, %s636_s12  ;;  %p96_p4 = scmp.eq.s32.totalorder %s471_s17, 1 }
   0xa   : > { %s712_s21 = scalar_select %p77_p1, %s644_s14, %s79_s19  }
   0xb   : > { %p714_p5 = por %p90_p2, %p89_p0  ;;  %p718_p6 = por %p96_p4, %p95_p3 }
   0xc   : > { %p474_p7 = scmp.ge.s32.totalorder %s648_s15, 1  ;;  %p174_p8 = scmp.lt.s32.totalorder %s648_s15, 3 }
   0xe   : > { %p175_p9 = pnand %p474_p7, %p174_p8 }
   0xf   : > { %s725_s24 = sshll.u32 (!%p175_p9), %s697_s16, 1  ;;  %s738_s30 = sand.u32 (!%p175_p9), 1, %s640_s13  }
  0x10   : > { %178 = sbr.rel (%p175_p9) target bundleno = 497 (0x1f1), region = 28  ;;  %p220_p10 = scmp.lt.s32.totalorder (!%p175_p9), %s725_s24, 2 }
  0x11   : > { %s475_s7 = sshll.u32 (!%p175_p9), %s738_s30, 4  ;;  %s480_s9 = sshll.u32 (!%p175_p9), %s697_s16, 4 }
  0x12   : > { %s751_s8 = scalar_lea.vmem (!%p175_p9), [#allocation4], %s475_s7  ;;  %s343_s17 = scalar_lea.hbm (!%p175_p9), %s851_s2, %s697_s16 }
  0x13   : > { %s207_s19 = scalar_lea.vmem (!%p175_p9), [#allocation2], %s738_s30  ;;  %s330_s27 = scalar_lea.sflag (!%p175_p9), [#allocation3], %s738_s30 }
  0x14   : > { %s345_s20 = sshll.u32 (!%p175_p9), %s207_s19, 4  ;;  %s346_s20 = int_to_ptr.vmem [resolvable:$true] %s345_s20 }
  0x15   : > { %v650_v0 = vmov 0   ;;  %s221_s25 = scalar_select %p220_p10, %s725_s24, 2  ;;  %v252_v4 = vlaneseq  ;;  %v651_v8 = vmov 0.0033333334   ;;  %vm266_vm2 = vcmask 261120  }
  0x16   : > { %541 = vset.pattern.permute.xlu0 %v650_v0  ;;  %542 = vset.pattern.permute.xlu2 %v650_v0  ;;  %vm294_vm5 = vcmask 7168   ;;  %v652_v19 = vmov 0.0   ;;  %v277_v21 = vstv %s480_s9 }
  0x17   : > { %s477_s26 = sshll.u32 %s221_s25, 3  ;;  %v741_v5 = vand.u32 127, %v252_v4  ;;  %v275_v20 = vshrl.u32 %v252_v4, 7  ;;  %s347_s25 = sshll.u32 %s343_s17, 4  ;;  %s348_s25 = int_to_ptr.hbm [resolvable:$true] %s347_s25 }
  0x18   : > { %s237_s29 = scalar_lea.vmem %s850_s1, %s477_s26  ;;  %s223_s6 = scalar_lea.vmem %s849_s0, %s477_s26 }
  0x19   : > { %v734_v1 = vld [vmem:[%s237_s29] sm:$0xff]  ;;  %v251_v2 = vld [vmem:[%s237_s29 + $0x8] sm:$0xff]  ;;  %v276_v22 = vadd.s32 8, %v275_v20  ;;  %v278_v24 = vadd.s32 %v277_v21, %v275_v20  ;;  %vm307_vm14 = vcmp.eq.s32.totalorder %v741_v5, 0  ;;  %s557_s28 = sshra.s32 %s348_s25, 4  ;;  %s558_s28 = int_to_ptr.hbm [resolvable:$true] %s557_s28 }
  0x1a   : > { %255 = vperm.xlu0 %541, %v734_v1   ;;  %vm312_vm0 = vcmp.eq.s32.totalorder %v251_v2, 0  ;;  %v248_v7 = vld [vmem:[%s223_s6] sm:$0xff]  ;;  %v249_v13 = vld [vmem:[%s223_s6 + $0x8] sm:$0xff]  ;;  %vm280_vm6 = vcmp.ne.s32.totalorder %v734_v1, 0  ;;  %vm281_vm8 = vcmp.ne.s32.totalorder %v251_v2, 0  ;;  %vm311_vm12 = vcmp.eq.s32.totalorder %v734_v1, 0  ;;  %p564_p0 = scmp.lt.s32.totalorder %s558_s28, %s851_s2 }
  0x1b   : > { %v314_v3 = vsel %vm312_vm0, 1, %v650_v0  ;;  %v288_v25 = vmul.f32 0.0033333334, %v248_v7  ;;  %v279_v27 = vadd.s32 %v277_v21, %v276_v22  ;;  %vm282_vm7 = vcmp.lt.s32.totalorder %v278_v24, 19  ;;  %s559_s29 = scalar_lea.hbm %s558_s28, 1  ;;  %s563_s6 = scalar_lea.hbm %s851_s2, 2 }
  0x1c   : > { %v289_v29 = vmul.f32 0.0033333334, %v249_v13  ;;  %vm284_vm10 = vmand %vm280_vm6, %vm282_vm7  ;;  %v313_v38 = vsel %vm311_vm12, 1, %v650_v0  ;;  %p560_p11 = scmp.ne.s32.totalorder %s558_s28, %s559_s29  ;;  %p565_p1 = scmp.lt.s32.totalorder %s563_s6, %s559_s29 }
  0x1d   : > { %vm283_vm9 = vcmp.lt.s32.totalorder %v279_v27, 19 }
  0x1e   : > { %vm285_vm11 = vmand %vm281_vm8, %vm283_vm9  ;;  %p561_p12 = pnand %p560_p11, %p714_p5  ;;  %p566_p2 = por %p565_p1, %p564_p0 }
  0x20   : > { %p562_p13 = pneg %p561_p12 }
  0x22   : > { %258 = vperm.xlu0 %541, %v251_v2   ;;  %p567_p3 = pnand %p566_p2, %p562_p13 }
  0x2a   : > { %319 = vperm.xlu0 %541, %v314_v3  }
  0x8c   : > { %v256_v6 = vpop.permute.xlu0 %255 }
  0x8d   : > { %vm260_vm1 = vcmp.eq.s32.totalorder %v741_v5, %v256_v6 }
  0x8e   : > { %v262_v9 = vsel %vm260_vm1, 0.9, %v651_v8 }
  0x8f   : > { %v264_v10 = vmul.f32 %v262_v9, %v248_v7 }
  0x91   : > { %v267_v11 = vsel %vm266_vm2, %v264_v10, 0.0 }
  0x92   : > { %268 = vadd.xlane.f32.xlu1 %v267_v11 }
  0x94   : > { %v259_v12 = vpop.permute.xlu0 %258 }
  0x95   : > { %vm261_vm3 = vcmp.eq.s32.totalorder %v741_v5, %v259_v12 }
  0x96   : > { %v263_v14 = vsel %vm261_vm3, 0.9, %v651_v8 }
  0x97   : > { %v265_v15 = vmul.f32 %v263_v14, %v249_v13 }
  0x99   : > { %v270_v16 = vsel %vm266_vm2, %v265_v15, 0.0 }
  0x9a   : > { %271 = vadd.xlane.f32.xlu1 %v270_v16 }
  0x9c   : > { %v320_v17 = vpop.permute.xlu0 %319 }
  0x9d   : > { %vm322_vm4 = vcmp.eq.s32.totalorder %v320_v17, 1 }
  0x9e   : > { %v324_v18 = vsel %vm322_vm4, 0.0, %v263_v14 }
  0x9f   : > { %326 = vst.msk [vmem:[%s751_s8 + $0x8] sm:$0xff] %vm266_vm2, %v324_v18 }
  0xa0   : > { %328 = vst.msk [vmem:[%s751_s8 + $0x8] sm:$0xff] %vm294_vm5, %v652_v19 }
 0x105   : > { %v269_v23 = vpop.xlane.xlu1 %268 }
 0x106   : > { %v286_v26 = vsub.f32 -0.66520274, %v269_v23 }
 0x108   : > { %v290_v28 = vadd.f32 %v288_v25, %v286_v26 }
 0x10a   : > { %v292_v33 = vsel %vm284_vm10, %v290_v28, 0.0 }
 0x10b   : > { %v295_v35 = vsel %vm294_vm5, %v292_v33, 0.0 }
 0x10d   : > { %v272_v30 = vpop.xlane.xlu1 %271 }
 0x10e   : > { %v287_v31 = vsub.f32 -0.66520274, %v272_v30 }
 0x110   : > { %v291_v32 = vadd.f32 %v289_v29, %v287_v31 }
 0x112   : > { %v293_v34 = vsel %vm285_vm11, %v291_v32, 0.0 }
 0x113   : > { %v296_v36 = vsel %vm294_vm5, %v293_v34, 0.0 }
 0x114   : > { %v297_v37 = vadd.f32 %v296_v36, %v295_v35 }
 0x116   : > { %298 = vadd.xlane.f32.xlu2 %v297_v37 }
 0x12e   : > { %316 = vperm.xlu2 %542, %v313_v38  }
 0x189   : > { %v299_v39 = vpop.xlane.xlu2 %298 }
 0x18a   : > { %v300_v40 = vrot.slane %v299_v39, 4 }
 0x18c   : > { %v301_v41 = vadd.f32 %v300_v40, %v299_v39 }
 0x18e   : > { %v302_v42 = vrot.slane %v301_v41, 2 }
 0x190   : > { %v303_v43 = vadd.f32 %v302_v42, %v301_v41 }
 0x191   : > { %v317_v44 = vpop.permute.xlu2 %316 }
 0x192   : > { %vm321_vm13 = vcmp.eq.s32.totalorder %v317_v44, 1  ;;  %v304_v45 = vrot.slane %v303_v43, 1 }
 0x193   : > { %v323_v46 = vsel %vm321_vm13, 0.0, %v262_v9 }
 0x194   : > { %325 = vst.msk [vmem:[%s751_s8] sm:$0xff] %vm266_vm2, %v323_v46  ;;  %v305_v47 = vadd.f32 %v304_v45, %v303_v43 }
 0x195   : > { %327 = vst.msk [vmem:[%s751_s8] sm:$0xff] %vm294_vm5, %v652_v19 }
 0x196   : > { %491 = vpush %v305_v47 }
 0x1c7   : > { %s492_s26 = spop %491 }
 0x1c8   : > { %v308_v48 = vstv %s492_s26 }
 0x1c9   : > { %v309_v49 = vsel %vm307_vm14, %v308_v48, 0.0 }
 0x1ca   : > { %310 = vst [vmem:[%s207_s19] sm:$0x1] %v309_v49 }
 0x1cb   : > { %570 = shalt.err (!%p567_p3)
}
 0x1cc   : > { %493 = dma.vmem_to_hbm [thread:$0]  (%p714_p5), %s346_s20, 16, %s348_s25, %s330_s27  }
 0x1cd   : > { %s334_s11 = scalar_lea.sflag [#allocation5], %s738_s30  ;;  %353 = sbr.rel (!%p714_p5) target bundleno = 497 (0x1f1), region = 36 }
 0x1ce   : > { %s355_s17 = ssub.s32 (%p714_p5), 3, %s725_s24 }
 0x1cf   : > { %p356_p4 = scmp.lt.s32.totalorder (%p714_p5), %s355_s17, 2 }
 0x1d2   : > { %s861_s17 = smov (!%p356_p4, %s355_s17), 2 }
 0x1d3   : > { %s483_s19 = sshll.u32 %s861_s17, 3 }
 0x1d4   : > { %s359_s26 = ssub.s32 16, %s483_s19 }
 0x1d5   : > { %s360_s28 = sshll.u32 %s359_s26, 4 }
 0x1d6   : > { %361 = vsyncadd %s334_s11, %s360_s28  ;;  %p795_p7 = scmp.ne.s32.totalorder %s483_s19, 0  ;;  %s364_s25 = scalar_lea.hbm %s852_s3, %s480_s9 }
 0x1d7   : > { %s366_s27 = sshll.u32 %s751_s8, 4  ;;  %s368_s29 = sshll.u32 %s364_s25, 4  ;;  %s805_s27 = int_to_ptr.vmem [resolvable:$true] %s366_s27  ;;  %s807_s29 = int_to_ptr.hbm [resolvable:$true] %s368_s29 }
 0x1d8   : > { %s487_s4 = sshll.u32 %s861_s17, 7  ;;  %s571_s5 = sshra.s32 %s805_s27, 4  ;;  %s572_s5 = int_to_ptr.vmem [resolvable:$true] %s571_s5 }
 0x1d9   : > { %s573_s6 = sshrl.u32 %s487_s4, 4  ;;  %s653_s16 = smov [#allocation4]  }
 0x1da   : > { %s578_s7 = scalar_lea.vmem %s572_s5, %s573_s6  ;;  %s582_s10 = scalar_lea.vmem %s653_s16, 32 }
 0x1db   : > { %p579_p5 = scmp.ne.s32.totalorder %s572_s5, %s578_s7  ;;  %p584_p10 = scmp.lt.s32.totalorder %s582_s10, %s578_s7 }
 0x1dd   : > { %p580_p8 = pnand %p579_p5, %p795_p7 }
 0x1df   : > { %p581_p9 = pneg %p580_p8 }
 0x1e1   : > { %p586_p11 = pnand %p584_p10, %p581_p9 }
 0x1e3   : > { %589 = shalt.err (!%p586_p11)
}
 0x1e4   : > { %s590_s8 = sshra.s32 %s807_s29, 4  ;;  %s601_s28 = scalar_lea.hbm %s852_s3, 24  ;;  %s591_s8 = int_to_ptr.hbm [resolvable:$true] %s590_s8 }
 0x1e5   : > { %s597_s9 = scalar_lea.hbm %s591_s8, %s573_s6  ;;  %p602_p1 = scmp.lt.s32.totalorder %s591_s8, %s852_s3 }
 0x1e6   : > { %p598_p12 = scmp.ne.s32.totalorder %s591_s8, %s597_s9  ;;  %p603_p2 = scmp.lt.s32.totalorder %s601_s28, %s597_s9 }
 0x1e8   : > { %p599_p13 = pnand %p598_p12, %p795_p7  ;;  %p604_p3 = por %p603_p2, %p602_p1 }
 0x1ea   : > { %p600_p0 = pneg %p599_p13 }
 0x1ec   : > { %p605_p4 = pnand %p604_p3, %p600_p0 }
 0x1ee   : > { %608 = shalt.err (!%p605_p4)
}
 0x1ef   : > { %s654_s25 = smov 128   ;;  %s655_s5 = smov 8  }
 0x1f0   : > { %374 = dma.vmem_to_hbm [thread:$0]  (%p795_p7), %s805_s27, %s487_s4, %s807_s29, %s334_s11, %s654_s25, %s654_s25, %s655_s5  }
 0x1f1 PF: > { %p503_p5 = scmp.ge.s32.totalorder %s648_s15, 2  ;;  %s383_s6 = sand.u32 1, %s636_s12  }
 0x1f2   : > { %s384_s7 = scalar_lea.sflag [#allocation3], %s383_s6 }
 0x1f3   : > { %p497_p8 = pnand %p503_p5, %p718_p6 }
 0x1f5   : > { %p498_p9 = pneg %p497_p8 }
 0x1f7   : > { %627 = dma.done.wait (%p498_p9), %s384_s7, 16  }
 0x1f8   : > { %629 = vsyncadd (%p498_p9), %s384_s7, 4294967280  ;;  %s393_s16 = scalar_lea.sflag [#allocation5], %s383_s6 }
 0x1f9   : > { %631 = dma.done.wait (%p498_p9), %s393_s16, 256  }
 0x1fa   : > { %633 = vsyncadd (%p498_p9), %s393_s16, 4294967040  ;;  %p17_p7 = scmp.ge.s32.totalorder %s701_s18, 4   ;;  %s856_s12 = smov %s640_s13 }
 0x1fb   : > { %s857_s13 = smov %s644_s14  ;;  %s858_s14 = smov %s712_s21 }
 0x1fc   : > { %s859_s15 = smov %s701_s18  ;;  %19 = sbr.rel (!%p17_p7) target bundleno = 5 (0x5), region = 83 }
 0x201   :  { %399 = vsyncpa [#allocation3], 1 }
 0x202   :  { %401 = vsyncpa [#allocation3 + $0x1], 1 }
 0x203   :  { %402 = vsyncpa [#allocation5], 1 }
 0x204   :  { %404 = vsyncpa [#allocation5 + $0x1], 1 }

</bundles_post_ra>
